<compile_context>
chip_gen: v7x
topology: tpu7x:2x2x1
jax: 0.10.0
libtpu: 0.0.40
codegen_flags: <defaults>
</compile_context>

<pallas_src>
import jax
import jax.numpy as jnp
from jax.experimental import pallas as pl
from jax.experimental.pallas import tpu as pltpu


def _gumbel_indexer_kernel(x_ref, wt_ref, emb_ref, emb_out_ref, idx_out_ref):
    # x_ref:   (tm, D)    input rows (dtype fixed in wrapper)
    # wt_ref:  (D,  C)    codebook Linear weight, pre-transposed (resident)
    # emb_ref: (C,  D)    embedding table (resident)
    #
    # logits = x @ W.T  -> (tm, C) on the MXU, f32 accumulation.
    logits = jnp.dot(x_ref[...], wt_ref[...],
                     preferred_element_type=jnp.float32)

    # one_hot(argmax(softmax(logits))); softmax is monotonic so argmax of the
    # logits is identical.  Ties resolve to the first (lowest) index, matching
    # torch.argmax / jnp.argmax semantics.
    tm, C = logits.shape
    row_max = jnp.max(logits, axis=-1, keepdims=True)                 # (tm, 1)
    lane = jax.lax.broadcasted_iota(jnp.int32, (tm, C), 1)            # (tm, C)
    candidates = jnp.where(logits == row_max, lane, C)                # (tm, C)
    arg = jnp.min(candidates, axis=-1, keepdims=True)                 # (tm, 1)
    one_hot = (lane == arg).astype(jnp.float32)                       # (tm, C)

    idx_out_ref[...] = one_hot

    # embeddings = indices @ E  -> (tm, D) on the MXU.
    emb = jnp.dot(one_hot.astype(emb_ref.dtype), emb_ref[...],
                  preferred_element_type=jnp.float32)
    emb_out_ref[...] = emb.astype(emb_out_ref.dtype)


def gumbel_indexer_forward(x, codebook_weight, embedding_table,
                           num_samples=1, tm=256, matmul_dtype=None):
    """x: [B, S, D]; codebook_weight: [C, D]; embedding_table: [C, D].

    matmul_dtype: optionally cast x / W.T to e.g. jnp.bfloat16 for the first
    matmul (bf16-native MXU on v5e; ~2x MXU rate on v6e/v7x).  Accumulation is
    always f32.  Note: near-tie argmax decisions may flip vs an f32 reference.
    """
    B, S, D = x.shape
    C, D2 = codebook_weight.shape
    assert D2 == D and embedding_table.shape == (C, D)
    M = B * S

    x2 = x.reshape(M, D)
    wt = codebook_weight.T                      # (D, C), cast once here
    if matmul_dtype is not None:
        x2 = x2.astype(matmul_dtype)
        wt = wt.astype(matmul_dtype)

    # ---- choose the row tile ------------------------------------------------
    # Big tiles keep the MXU fed (measured ~85% of roofline at 512+ vs ~30% at
    # 128); keep >=2 grid steps where possible so v7x's 2 TensorCores both get
    # work; keep the working set inside the (v7x-sized) scoped VMEM budget.
    tm = max(8, (int(tm) // 8) * 8)
    half = -(-M // 2)                           # ceil(M/2)
    half = -(-half // 8) * 8                    # round up to sublane multiple
    tm = min(tm, max(8, half))

    def vmem_need(t):
        # single-buffered resident weights + double-buffered tile I/O
        w = D * C * wt.dtype.itemsize + C * D * embedding_table.dtype.itemsize
        per_step = (t * D * x2.dtype.itemsize            # x tile in
                    + t * D * x.dtype.itemsize           # emb tile out
                    + t * C * 4)                         # one-hot tile out
        return w + 2 * per_step

    while tm > 8 and vmem_need(tm) > (40 << 20):
        tm = max(8, ((tm // 2) // 8) * 8)

    # ---- ragged tail: pad rows up to a tile multiple -------------------------
    M_pad = -(-M // tm) * tm
    if M_pad != M:
        x2 = jnp.pad(x2, ((0, M_pad - M), (0, 0)))

    vmem_limit = int(min(max(vmem_need(tm) + (8 << 20), 32 << 20), 64 << 20))

    emb_flat, idx_flat = pl.pallas_call(
        _gumbel_indexer_kernel,
        out_shape=(
            jax.ShapeDtypeStruct((M_pad, D), x.dtype),      # embeddings (type_as(x))
            jax.ShapeDtypeStruct((M_pad, C), jnp.float32),  # one-hot indices (f32)
        ),
        grid_spec=pltpu.PrefetchScalarGridSpec(
            num_scalar_prefetch=0,
            grid=(M_pad // tm,),
            in_specs=[
                pl.BlockSpec((tm, D), lambda i: (i, 0)),            # x tile
                pl.BlockSpec((D, C), lambda i: (0, 0),              # W.T, resident
                             pipeline_mode=pl.Buffered(1)),
                pl.BlockSpec((C, D), lambda i: (0, 0),              # E, resident
                             pipeline_mode=pl.Buffered(1)),
            ],
            out_specs=[
                pl.BlockSpec((tm, D), lambda i: (i, 0)),
                pl.BlockSpec((tm, C), lambda i: (i, 0)),
            ],
        ),
        compiler_params=pltpu.CompilerParams(
            dimension_semantics=("parallel",),
            vmem_limit_bytes=vmem_limit),
    )(x2, wt, embedding_table)

    emb_flat = emb_flat[:M]
    idx_flat = idx_flat[:M]

    # num_samples expansion: logits are identical across samples in the
    # deterministic path, so this stays a pure broadcast (no extra HBM traffic).
    emb = jnp.broadcast_to(emb_flat.reshape(B, S, 1, D), (B, S, num_samples, D))
    idx = jnp.broadcast_to(idx_flat.reshape(B, S, 1, C), (B, S, num_samples, C))
    return emb, idx


def _reference(x, codebook_weight, embedding_table, num_samples=1):
    logits = jnp.einsum("bsd,cd->bsc", x, codebook_weight)
    probs = jax.nn.softmax(logits.astype(jnp.float32), axis=-1)
    arg = jnp.argmax(probs, axis=-1)
    one_hot = jax.nn.one_hot(arg, codebook_weight.shape[0], dtype=jnp.float32)
    emb = jnp.einsum("bsc,cd->bsd", one_hot, embedding_table).astype(x.dtype)
    emb = jnp.broadcast_to(emb[:, :, None, :],
                           (x.shape[0], x.shape[1], num_samples, x.shape[2]))
    idx = jnp.broadcast_to(one_hot[:, :, None, :],
                           (x.shape[0], x.shape[1], num_samples,
                            codebook_weight.shape[0]))
    return emb, idx


if __name__ == "__main__":
    B, S, D, C = 2, 8, 32, 128   # batch, seq, input_dim(=output_dim), codebook_size
    num_samples = 2

    key = jax.random.PRNGKey(0)
    kx, kw, ke = jax.random.split(key, 3)
    x = jax.random.normal(kx, (B, S, D), dtype=jnp.float32)
    # nn.Linear(output_dim, codebook_size, bias=False).weight -> (C, D)
    codebook_weight = jax.random.normal(kw, (C, D), dtype=jnp.float32) * 0.1
    # nn.Embedding(codebook_size, output_dim).weight -> (C, D)
    embedding_table = jax.random.normal(ke, (C, D), dtype=jnp.float32)

    emb, idx = gumbel_indexer_forward(x, codebook_weight, embedding_table,
                                      num_samples=num_samples)
    emb = jax.block_until_ready(emb)
    idx = jax.block_until_ready(idx)

    emb_ref, idx_ref = _reference(x, codebook_weight, embedding_table,
                                  num_samples=num_samples)
    assert emb.shape == (B, S, num_samples, D)
    assert idx.shape == (B, S, num_samples, C)
    assert jnp.allclose(idx, idx_ref)
    assert jnp.allclose(emb, emb_ref, atol=1e-5)
    print("KERNEL_OK")
</pallas_src>

<mosaic_0001>
module attributes {stable_mosaic.version = 11 : i64} {
  func.func @_gumbel_indexer_kernel(%arg0: i32, %arg1: memref<8x32xf32, #tpu.memory_space<vmem>>, %arg2: memref<32x128xf32, #tpu.memory_space<vmem>>, %arg3: memref<128x32xf32, #tpu.memory_space<vmem>>, %arg4: memref<8x32xf32, #tpu.memory_space<vmem>>, %arg5: memref<8x128xf32, #tpu.memory_space<vmem>>) attributes {dimension_semantics = [#tpu.dimension_semantics<parallel>], iteration_bounds = array<i64: 2>, scalar_prefetch = 0 : i64, scratch_operands = 0 : i64, tpu.core_type = #tpu.core_type<tc>, window_params = [{transform_indices = @transform_0, window_bounds = array<i64: 8, 32>}, {pipeline_mode = #tpu.pipeline_mode<synchronous>, transform_indices = @transform_1, window_bounds = array<i64: 32, 128>}, {pipeline_mode = #tpu.pipeline_mode<synchronous>, transform_indices = @transform_2, window_bounds = array<i64: 128, 32>}, {transform_indices = @transform_3, window_bounds = array<i64: 8, 32>}, {transform_indices = @transform_4, window_bounds = array<i64: 8, 128>}]} {
    %c0 = arith.constant 0 : index
    %c0_0 = arith.constant 0 : index
    %0 = vector.load %arg1[%c0, %c0_0] : memref<8x32xf32, #tpu.memory_space<vmem>>, vector<8x32xf32>
    %c0_1 = arith.constant 0 : index
    %c0_2 = arith.constant 0 : index
    %1 = vector.load %arg2[%c0_1, %c0_2] : memref<32x128xf32, #tpu.memory_space<vmem>>, vector<32x128xf32>
    %cst = arith.constant dense<0.000000e+00> : vector<8x128xf32>
    %2 = tpu.matmul %0, %1, %cst {dimension_numbers = #tpu.dot_dimension_numbers<[1], [0], [0], [1], [0, 0, 1, 1], [], []>} : vector<8x32xf32>, vector<32x128xf32>, vector<8x128xf32> -> vector<8x128xf32>
    %cst_3 = arith.constant dense<0xFF800000> : vector<8xf32>
    %3 = vector.multi_reduction <maximumf>, %2, %cst_3 [1] : vector<8x128xf32> to vector<8xf32>
    %4 = vector.shape_cast %3 : vector<8xf32> to vector<8x1xf32>
    %5 = tpu.iota {dimensions = array<i32: 1>} : vector<8x128xi32>
    %6 = vector.broadcast %4 : vector<8x1xf32> to vector<8x128xf32>
    %7 = arith.cmpf oeq, %2, %6 : vector<8x128xf32>
    %c128_i32 = arith.constant 128 : i32
    %8 = vector.broadcast %c128_i32 : i32 to vector<8x128xi32>
    %9 = arith.select %7, %5, %8 : vector<8x128xi1>, vector<8x128xi32>
    %cst_4 = arith.constant dense<2147483647> : vector<8xi32>
    %10 = vector.multi_reduction <minsi>, %9, %cst_4 [1] : vector<8x128xi32> to vector<8xi32>
    %11 = vector.shape_cast %10 : vector<8xi32> to vector<8x1xi32>
    %12 = vector.broadcast %11 : vector<8x1xi32> to vector<8x128xi32>
    %13 = arith.cmpi eq, %5, %12 : vector<8x128xi32>
    %14 = arith.extui %13 : vector<8x128xi1> to vector<8x128xi32>
    %15 = arith.sitofp %14 : vector<8x128xi32> to vector<8x128xf32>
    %c0_5 = arith.constant 0 : index
    %c0_6 = arith.constant 0 : index
    %16 = vector.load %arg5[%c0_5, %c0_6] : memref<8x128xf32, #tpu.memory_space<vmem>>, vector<8x128xf32>
    tpu.vector_store %arg5[%c0_5, %c0_6], %15 {strides = array<i32>} : memref<8x128xf32, #tpu.memory_space<vmem>>, vector<8x128xf32>,
    %c0_7 = arith.constant 0 : index
    %c0_8 = arith.constant 0 : index
    %17 = vector.load %arg3[%c0_7, %c0_8] : memref<128x32xf32, #tpu.memory_space<vmem>>, vector<128x32xf32>
    %cst_9 = arith.constant dense<0.000000e+00> : vector<8x32xf32>
    %18 = tpu.matmul %15, %17, %cst_9 {dimension_numbers = #tpu.dot_dimension_numbers<[1], [0], [0], [1], [0, 0, 1, 1], [], []>} : vector<8x128xf32>, vector<128x32xf32>, vector<8x32xf32> -> vector<8x32xf32>
    %c0_10 = arith.constant 0 : index
    %c0_11 = arith.constant 0 : index
    %19 = vector.load %arg4[%c0_10, %c0_11] : memref<8x32xf32, #tpu.memory_space<vmem>>, vector<8x32xf32>
    tpu.vector_store %arg4[%c0_10, %c0_11], %18 {strides = array<i32>} : memref<8x32xf32, #tpu.memory_space<vmem>>, vector<8x32xf32>,
    return
  }
  func.func @transform_0(%arg0: i32) -> (i32, i32) {
    %c0_i32 = arith.constant 0 : i32
    %c0_i32_0 = arith.constant 0 : i32
    return %arg0, %c0_i32 : i32, i32
  }
  func.func @transform_1(%arg0: i32) -> (i32, i32) {
    %c0_i32 = arith.constant 0 : i32
    %c0_i32_0 = arith.constant 0 : i32
    %c0_i32_1 = arith.constant 0 : i32
    return %c0_i32, %c0_i32_0 : i32, i32
  }
  func.func @transform_2(%arg0: i32) -> (i32, i32) {
    %c0_i32 = arith.constant 0 : i32
    %c0_i32_0 = arith.constant 0 : i32
    %c0_i32_1 = arith.constant 0 : i32
    return %c0_i32, %c0_i32_0 : i32, i32
  }
  func.func @transform_3(%arg0: i32) -> (i32, i32) {
    %c0_i32 = arith.constant 0 : i32
    %c0_i32_0 = arith.constant 0 : i32
    return %arg0, %c0_i32 : i32, i32
  }
  func.func @transform_4(%arg0: i32) -> (i32, i32) {
    %c0_i32 = arith.constant 0 : i32
    %c0_i32_0 = arith.constant 0 : i32
    return %arg0, %c0_i32 : i32, i32
  }
}

</mosaic_0001>

<bundles_post_ra>
// kernel: tpu_custom_call.1
= control target key start
LH: loop header
LB: loop body
LE: loop exit
PB: predicated region body
PF: predicated region fallthrough
CT: control target
= control target key end

     0   :  { %10 = vsyncpa [#allocation3], 0  ;;  %s1020_s0 = inlined_call_operand.vmem [shape: f32[16,32], index: 0, kind: input, shape index: {}]   ;;  %s1021_s1 = inlined_call_operand.vmem [shape: f32[32,128], index: 1, kind: input, shape index: {}]   ;;  %s1022_s2 = inlined_call_operand.vmem [shape: f32[128,32], index: 2, kind: input, shape index: {}]   ;;  %s1023_s3 = inlined_call_operand.hbm [shape: f32[16,32], index: 3, kind: output, shape index: {0}]   ;;  %s1024_s4 = inlined_call_operand.hbm [shape: f32[16,128], index: 4, kind: output, shape index: {1}]  }
   0x1   :  { %12 = vsyncpa [#allocation3 + $0x1], 0 }
   0x2   :  { %13 = vsyncpa [#allocation5], 0 }
   0x3   :  { %15 = vsyncpa [#allocation5 + $0x1], 0  ;;  %s806_s15 = smov 0   ;;  %s808_s16 = smov 0  }
   0x4   :  { %s810_s17 = smov 0   ;;  %s812_s18 = smov 0  }
   0x5 LB: > { %s827_s19 = sadd.s32 4294967295, %s773_s18   ;;  %s517_s20 = sadd.s32 4294967294, %s773_s18   ;;  %s773_s18 = sphi %s812_s18, %s1030_s18   ;;  %s769_s17 = sphi %s810_s17, %s1029_s17   ;;  %s765_s16 = sphi %s808_s16, %s1028_s16   ;;  %s761_s15 = sphi %s806_s15, %s1027_s15  }
   0x6   : > { %s831_s21 = sadd.s32 1, %s773_s18   ;;  %s96_s22 = sadd.s32 1, %s769_s17 }
   0x7   : > { %s93_s23 = ssub.s32 %s773_s18, %s831_s21  ;;  %p106_p0 = scmp.ne.s32.totalorder %s769_s17, %s765_s16 }
   0x8   : > { %p94_p1 = scmp.eq.s32.totalorder %s93_s23, 0  ;;  %p107_p2 = scmp.eq.s32.totalorder %s827_s19, 1 }
   0x9   : > { %p112_p3 = scmp.ne.s32.totalorder %s765_s16, %s761_s15  ;;  %p113_p4 = scmp.eq.s32.totalorder %s517_s20, 1 }
   0xa   : > { %s842_s24 = scalar_select %p94_p1, %s769_s17, %s96_s22  }
   0xb   : > { %p844_p5 = por %p107_p2, %p106_p0  ;;  %p848_p6 = por %p113_p4, %p112_p3 }
   0xc   : > { %p520_p7 = scmp.ge.s32.totalorder %s773_s18, 1  ;;  %p170_p8 = scmp.lt.s32.totalorder %s773_s18, 3 }
   0xe   : > { %p171_p9 = pnand %p520_p7, %p170_p8 }
   0xf   : > { %v205_v0 = vld [vmem:[%s1021_s1] sm:$0xff] (!%p171_p9)  ;;  %v206_v1 = vld [vmem:[%s1021_s1 + $0x8] sm:$0xff] (!%p171_p9)  ;;  %v207_v2 = vld [vmem:[%s1021_s1 + $0x10] sm:$0xff] (!%p171_p9)  ;;  %v775_v3 = vmov (!%p171_p9), 0.0|0.0   ;;  %vm776_vm0 = vmmov (!%p171_p9), 0   ;;  %v777_v6 = vmov (!%p171_p9), 0.0   ;;  %v285_v11 = vlaneseq (!%p171_p9) }
  0x10   : > { %174 = sbr.rel (%p171_p9) target bundleno = 905 (0x389), region = 32  ;;  %601 = vmatprep.subr.bf16.mxu0 (!%p171_p9), %v775_v3  ;;  %v602_v4 = vpack.c.bf16 (!%p171_p9), %v206_v1, %v205_v0  ;;  %v208_v5 = vld [vmem:[%s1021_s1 + $0x18] sm:$0xff] (!%p171_p9)  ;;  %563 = vmatprep.mubr.msk.f32.mxu0 (!%p171_p9), %vm776_vm0, %v777_v6  ;;  %p200_p10 = scmp.lt.s32.totalorder (!%p171_p9), %s827_s19, 1  ;;  %vm209_vm1 = vcmask (!%p171_p9), 261120   ;;  %v307_v17 = vld [vmem:[%s1022_s2] sm:$0xff] (!%p171_p9)  ;;  %v308_v18 = vld [vmem:[%s1022_s2 + $0x8] sm:$0xff] (!%p171_p9) }
  0x11   : > { %607 = vmatprep.subr.bf16.mxu1 (!%p171_p9), %v775_v3  ;;  %598 = vmatprep.mubr.msk.f32.mxu1 (!%p171_p9), %vm776_vm0, %v777_v6  ;;  %v605_v7 = vpack.c.bf16 (!%p171_p9), %v208_v5, %v207_v2  ;;  %v877_v12 = vand.u32 (!%p171_p9), 127, %v285_v11  ;;  %v309_v19 = vld [vmem:[%s1022_s2 + $0x10] sm:$0xff] (!%p171_p9)  ;;  %v608_v20 = vpack.c.bf16 (!%p171_p9), %v308_v18, %v307_v17  ;;  %v310_v21 = vld [vmem:[%s1022_s2 + $0x18] sm:$0xff] (!%p171_p9)  ;;  %v311_v23 = vld [vmem:[%s1022_s2 + $0x20] sm:$0xff] (!%p171_p9)  ;;  %s936_s12 = sand.u32 (!%p171_p9), 1, %s765_s16   ;;  %v778_v50 = vmov (!%p171_p9), 1.0  }
  0x12   : > { %603 = vmatpush3.bf16.msra.mxu0 (!%p171_p9), %v602_v4  ;;  %v611_v22 = vpack.c.bf16 (!%p171_p9), %v310_v21, %v309_v19  ;;  %v312_v24 = vld [vmem:[%s1022_s2 + $0x28] sm:$0xff] (!%p171_p9)  ;;  %v313_v26 = vld [vmem:[%s1022_s2 + $0x30] sm:$0xff] (!%p171_p9)  ;;  %v314_v27 = vld [vmem:[%s1022_s2 + $0x38] sm:$0xff] (!%p171_p9)  ;;  %s529_s20 = sshll.u32 (!%p171_p9), %s827_s19, 7  ;;  %s400_s29 = scalar_lea.sflag (!%p171_p9), [#allocation5], %s936_s12 }
  0x13   : > { %604 = vmatprep.subr.bf16.mxu0 (!%p171_p9), %v775_v3  ;;  %609 = vmatpush3.bf16.msra.mxu1 (!%p171_p9), %v608_v20  ;;  %v614_v25 = vpack.c.bf16 (!%p171_p9), %v312_v24, %v311_v23  ;;  %v617_v28 = vpack.c.bf16 (!%p171_p9), %v314_v27, %v313_v26  ;;  %v315_v29 = vld [vmem:[%s1022_s2 + $0x40] sm:$0xff] (!%p171_p9)  ;;  %v316_v30 = vld [vmem:[%s1022_s2 + $0x48] sm:$0xff] (!%p171_p9)  ;;  %v317_v32 = vld [vmem:[%s1022_s2 + $0x50] sm:$0xff] (!%p171_p9)  ;;  %s949_s27 = scalar_lea.hbm (!%p171_p9), %s1024_s4, %s529_s20  ;;  %s779_s5 = smov (!%p171_p9), [#allocation4]  }
  0x14   : > { %610 = vmatprep.subr.bf16.mxu1 (!%p171_p9), %v775_v3  ;;  %v620_v31 = vpack.c.bf16 (!%p171_p9), %v316_v30, %v315_v29  ;;  %v318_v33 = vld [vmem:[%s1022_s2 + $0x58] sm:$0xff] (!%p171_p9)  ;;  %v319_v35 = vld [vmem:[%s1022_s2 + $0x60] sm:$0xff] (!%p171_p9)  ;;  %v320_v36 = vld [vmem:[%s1022_s2 + $0x68] sm:$0xff] (!%p171_p9)  ;;  %s683_s6 = sshll.u32 (!%p171_p9), %s779_s5, 4  ;;  %s684_s6 = int_to_ptr.vmem [resolvable:$false] %s683_s6 }
  0x15   : > { %v623_v34 = vpack.c.bf16 (!%p171_p9), %v318_v33, %v317_v32  ;;  %v626_v37 = vpack.c.bf16 (!%p171_p9), %v320_v36, %v319_v35  ;;  %v321_v42 = vld [vmem:[%s1022_s2 + $0x70] sm:$0xff] (!%p171_p9)  ;;  %v322_v43 = vld [vmem:[%s1022_s2 + $0x78] sm:$0xff] (!%p171_p9)  ;;  %s685_s7 = scalar_lea.vmem (!%p171_p9), %s684_s6, 256 }
  0x16   : > { %606 = vmatpush3.bf16.msra.mxu0 (!%p171_p9), %v605_v7  ;;  %v629_v44 = vpack.c.bf16 (!%p171_p9), %v322_v43, %v321_v42 }
  0x17   : > { %s201_s9 = scalar_select %p200_p10, %s827_s19, 1  ;;  %612 = vmatpush3.bf16.msra.mxu1 %v611_v22 }
  0x18   : > { %613 = vmatprep.subr.bf16.mxu1 %v775_v3 }
  0x19   : > { %s523_s10 = sshll.u32 %s201_s9, 3 }
  0x1a   : > { %s203_s13 = scalar_lea.vmem %s1020_s0, %s523_s10 }
  0x1b   : > { %v204_v8 = vld [vmem:[%s203_s13] sm:$0xff]  ;;  %615 = vmatpush3.bf16.msra.mxu1 %v614_v25  ;;  %s521_s13 = sshll.u32 %s936_s12, 3 }
  0x1c   : > { %564 = vmatmul.mubr.msk.f32.vlgmr.msra.gmra.mrb[0].mxu0 %vm209_vm1, %v204_v8  ;;  %616 = vmatprep.subr.bf16.mxu1 %v775_v3  ;;  %s199_s14 = scalar_lea.vmem [#allocation4], %s521_s13 }
  0x1d   : > { %s426_s28 = sshll.u32 %s199_s14, 4  ;;  %s427_s28 = int_to_ptr.vmem [resolvable:$true] %s426_s28 }
  0x1e   : > { %s679_s30 = scalar_lea.vmem %s427_s28, 128  ;;  %p686_p0 = scmp.lt.s32.totalorder %s427_s28, %s684_s6 }
  0x1f   : > { %618 = vmatpush3.bf16.msra.mxu1 %v617_v28  ;;  %p680_p11 = scmp.ne.s32.totalorder %s427_s28, %s679_s30  ;;  %p687_p1 = scmp.lt.s32.totalorder %s685_s7, %s679_s30 }
  0x20   : > { %619 = vmatprep.subr.bf16.mxu1 %v775_v3 }
  0x21   : > { %p681_p12 = pnand %p680_p11, %p844_p5  ;;  %p688_p2 = por %p687_p1, %p686_p0 }
  0x23   : > { %621 = vmatpush3.bf16.msra.mxu1 %v620_v31  ;;  %p682_p13 = pneg %p681_p12 }
  0x24   : > { %622 = vmatprep.subr.bf16.mxu1 %v775_v3 }
  0x25   : > { %p689_p3 = pnand %p688_p2, %p682_p13 }
  0x27   : > { %624 = vmatpush3.bf16.msra.mxu1 %v623_v34 }
  0x28   : > { %625 = vmatprep.subr.bf16.mxu1 %v775_v3 }
  0x2b   : > { %627 = vmatpush3.bf16.msra.mxu1 %v626_v37 }
  0x2c   : > { %628 = vmatprep.subr.bf16.mxu1 %v775_v3 }
  0x2f   : > { %630 = vmatpush3.bf16.msra.mxu1 %v629_v44 }
  0xef   : > { %v279_v9 = vpop.f32.mrb[0].mxu0 }
  0xf0   : > { %283 = vmax.xlane.f32.xlu0 %v279_v9  ;;  %v565_v10 = vpop.f32.mrb[1].mxu0 }
 0x17d   : > { %v284_v13 = vpop.xlane.xlu0 %283 }
 0x17e   : > { %vm287_vm2 = vcmp.eq.f32.partialorder %v279_v9, %v284_v13 }
 0x17f   : > { %v288_v14 = vsel %vm287_vm2, %v877_v12, 128 }
 0x180   : > { %v290_v15 = vshra.s32 %v288_v14, 16  ;;  %v289_v38 = vand.u32 65535, %v288_v14 }
 0x182   : > { %v292_v16 = vcvt.s32.f32 %v290_v15  ;;  %v291_v40 = vcvt.s32.f32 %v289_v38 }
 0x184   : > { %293 = vmin.xlane.f32.xlu0 %v292_v16 }
 0x211   : > { %v294_v39 = vpop.xlane.xlu0 %293 }
 0x212   : > { %vm295_vm3 = vcmp.eq.f32.partialorder %v292_v16, %v294_v39  ;;  %v300_v45 = vcvt.f32.s32 %v294_v39 }
 0x213   : > { %v296_v41 = vsel %vm295_vm3, %v291_v40, inf }
 0x214   : > { %297 = vmin.xlane.f32.xlu1 %v296_v41  ;;  %v301_v47 = vshll.u32 %v300_v45, 16 }
 0x2a1   : > { %v298_v46 = vpop.xlane.xlu1 %297 }
 0x2a2   : > { %v299_v48 = vcvt.f32.s32 %v298_v46 }
 0x2a4   : > { %v302_v49 = vadd.s32 %v301_v47, %v299_v48 }
 0x2a6   : > { %vm303_vm4 = vcmp.eq.s32.totalorder %v877_v12, %v302_v49 }
 0x2a7   : > { %599 = vmatmul.mubr.msk.f32.vlgmr.msra.gmra.mrb[0].mxu1 %vm303_vm4, %v778_v50  ;;  %v525_v51 = vsel %vm303_vm4, 1.0, %v777_v6 }
 0x2a8   : > { %306 = vst [vmem:[%s199_s14] sm:$0xff] %v525_v51 }
 0x2a9   : > { %692 = shalt.err (!%p689_p3)
}
 0x2aa   : > { %s693_s8 = scalar_lea.hbm %s949_s27, 128  ;;  %s697_s11 = scalar_lea.hbm %s1024_s4, 256 }
 0x2ab   : > { %p694_p4 = scmp.ne.s32.totalorder %s949_s27, %s693_s8  ;;  %p698_p9 = scmp.lt.u32.totalorder %s949_s27, %s1024_s4 }
 0x2ac   : > { %p699_p10 = scmp.lt.u32.totalorder %s697_s11, %s693_s8  ;;  %p701_p12 = scmp.lt.u32.totalorder %s693_s8, %s949_s27 }
 0x2ad   : > { %p695_p7 = pnand %p694_p4, %p844_p5 }
 0x2ae   : > { %p700_p11 = por %p699_p10, %p698_p9 }
 0x2af   : > { %p696_p8 = pneg %p695_p7 }
 0x2b0   : > { %p702_p13 = por %p701_p12, %p700_p11 }
 0x2b2   : > { %p703_p0 = pnand %p702_p13, %p696_p8 }
 0x2b4   : > { %706 = shalt.err (!%p703_p0)
}
 0x2b5   : > { %632 = dma.vmem_to_hbm [thread:$0]  (%p844_p5), %s427_s28, 128, %s949_s27, %s400_s29  }
 0x2b6   : > { %s192_s23 = scalar_lea.vmem [#allocation2], %s521_s13  ;;  %s976_s7 = scalar_lea.hbm %s1023_s3, %s529_s20 }
 0x2b7   : > { %s413_s30 = sshll.u32 %s192_s23, 4  ;;  %s395_s8 = scalar_lea.sflag [#allocation3], %s936_s12  ;;  %s978_s30 = int_to_ptr.vmem [resolvable:$true] %s413_s30 }
 0x2b8   : > { %s707_s27 = scalar_lea.vmem %s978_s30, 128  ;;  %s780_s19 = smov [#allocation2]  }
 0x2b9   : > { %p708_p1 = scmp.ne.s32.totalorder %s978_s30, %s707_s27  ;;  %s711_s13 = sshll.u32 %s780_s19, 4  ;;  %s712_s13 = int_to_ptr.vmem [resolvable:$false] %s711_s13 }
 0x2ba   : > { %s713_s20 = scalar_lea.vmem %s712_s13, 256  ;;  %p714_p4 = scmp.lt.s32.totalorder %s978_s30, %s712_s13 }
 0x2bb   : > { %p709_p2 = pnand %p708_p1, %p844_p5  ;;  %p715_p7 = scmp.lt.s32.totalorder %s713_s20, %s707_s27 }
 0x2bd   : > { %p710_p3 = pneg %p709_p2  ;;  %p716_p8 = por %p715_p7, %p714_p4 }
 0x2bf   : > { %p717_p9 = pnand %p716_p8, %p710_p3 }
 0x37a   : > { %v389_v52 = vpop.f32.mrb[0].mxu1 }
 0x37b   : > { %393 = vst.msk [vmem:[%s192_s23] sm:$0xff] %vm209_vm1, %v389_v52  ;;  %v600_v53 = vpop.f32.mrb[1].mxu1 }
 0x37c   : > { %720 = shalt.err (!%p717_p9)
}
 0x37d   : > { %s721_s12 = scalar_lea.hbm %s976_s7, 128  ;;  %s725_s9 = scalar_lea.hbm %s1023_s3, 256 }
 0x37e   : > { %p722_p10 = scmp.ne.s32.totalorder %s976_s7, %s721_s12  ;;  %p726_p13 = scmp.lt.u32.totalorder %s976_s7, %s1023_s3 }
 0x37f   : > { %p727_p0 = scmp.lt.u32.totalorder %s725_s9, %s721_s12  ;;  %p729_p2 = scmp.lt.u32.totalorder %s721_s12, %s976_s7 }
 0x380   : > { %p723_p11 = pnand %p722_p10, %p844_p5 }
 0x381   : > { %p728_p1 = por %p727_p0, %p726_p13 }
 0x382   : > { %p724_p12 = pneg %p723_p11 }
 0x383   : > { %p730_p3 = por %p729_p2, %p728_p1 }
 0x385   : > { %p731_p4 = pnand %p730_p3, %p724_p12 }
 0x387   : > { %734 = shalt.err (!%p731_p4)
}
 0x388   : > { %631 = dma.vmem_to_hbm [thread:$0]  (%p844_p5), %s978_s30, 128, %s976_s7, %s395_s8  }
 0x389 PF: > { %p642_p7 = scmp.ge.s32.totalorder %s773_s18, 2  ;;  %s438_s14 = sand.u32 1, %s761_s15  }
 0x38a   : > { %s439_s22 = scalar_lea.sflag [#allocation3], %s438_s14 }
 0x38b   : > { %p636_p8 = pnand %p642_p7, %p848_p6 }
 0x38d   : > { %752 = dma.done.wait (!%p636_p8), %s439_s22, 128  }
 0x38e   : > { %754 = vsyncadd (!%p636_p8), %s439_s22, 4294967168  ;;  %s448_s23 = scalar_lea.sflag [#allocation5], %s438_s14 }
 0x38f   : > { %756 = dma.done.wait (!%p636_p8), %s448_s23, 128  }
 0x390   : > { %758 = vsyncadd (!%p636_p8), %s448_s23, 4294967168  ;;  %p18_p5 = scmp.ge.s32.totalorder %s831_s21, 4   ;;  %s1027_s15 = smov %s765_s16 }
 0x391   : > { %s1028_s16 = smov %s769_s17  ;;  %s1029_s17 = smov %s842_s24 }
 0x392   : > { %s1030_s18 = smov %s831_s21  ;;  %20 = sbr.rel (!%p18_p5) target bundleno = 5 (0x5), region = 84 }
 0x399   :  { %453 = vsyncpa [#allocation3], 1 }
 0x39a   :  { %455 = vsyncpa [#allocation3 + $0x1], 1 }
 0x39b   :  { %456 = vsyncpa [#allocation5], 1 }
 0x39c   :  { %458 = vsyncpa [#allocation5 + $0x1], 1 }

</bundles_post_ra>
